<compile_context>
chip_gen: v6e
topology: v6e:2x2x1
jax: 0.10.0
libtpu: 0.0.40
codegen_flags: <defaults>
</compile_context>

<pallas_src>
import functools

import jax
import jax.numpy as jnp
from jax import lax
from jax.experimental import pallas as pl
from jax.experimental.pallas import tpu as pltpu


def _lstm_error_kernel(x_ref, w_ih_ref, w_hh_ref, b_ref, w_out_ref, b_out_ref,
                       err_ref, gx_ref, hs_ref, *, hidden_size):
    """LSTM recurrence + deferred linear head + squared-error reduction.

    x_ref:     (S, F)       input sequence (VMEM)
    w_ih_ref:  (F, 4H)      input->gates weights (pre-transposed)
    w_hh_ref:  (H, 4H)      hidden->gates weights (pre-transposed)
    b_ref:     (1, 4H)      combined gate bias (b_ih + b_hh)
    w_out_ref: (H, F)       output projection (pre-transposed)
    b_out_ref: (1, F)       output projection bias
    err_ref:   (1, S-1)     per-timestep squared error (lane-dense output)
    gx_ref:    (S-1, 4H)    scratch: hoisted input projection (x[:-1]@W_ih + b)
    hs_ref:    (S-1, H)     scratch: hidden-state history
    """
    H = hidden_size
    G = 4 * H
    S = x_ref.shape[0]
    F = x_ref.shape[1]

    # --- Hoisted input projection: one batched MXU matmul --------------------
    gx_ref[...] = (jnp.dot(x_ref[:-1, :], w_ih_ref[...],
                           preferred_element_type=jnp.float32)
                   + b_ref[...])                                   # (S-1, 4H)

    w_hh = w_hh_ref[...]                                           # (H, 4H)

    # Lane mask for the tanh-activated `g` block (PyTorch gate order i, f, g, o).
    lane = lax.broadcasted_iota(jnp.int32, (1, G), 1)              # hoisted
    g_mask = (lane >= 2 * H) & (lane < 3 * H)

    def step(t, carry):
        h, c = carry                                               # (1, H)
        # Only the recurrent matmul stays on the serial critical path.
        gates = (jnp.dot(h, w_hh, preferred_element_type=jnp.float32)
                 + gx_ref[pl.ds(t, 1), :])                         # (1, 4H)
        # Single full-lane-width activation pass (one tanh + one sigmoid push),
        # then cheap static lane slices pick the gate blocks.
        act = jnp.where(g_mask, jnp.tanh(gates), jax.nn.sigmoid(gates))
        i_g = act[:, 0 * H:1 * H]
        f_g = act[:, 1 * H:2 * H]
        g_g = act[:, 2 * H:3 * H]
        o_g = act[:, 3 * H:4 * H]
        c_new = f_g * c + i_g * g_g
        h_new = o_g * jnp.tanh(c_new)
        hs_ref[pl.ds(t, 1), :] = h_new           # off the dependency chain
        return h_new, c_new

    zeros = jnp.zeros((1, H), jnp.float32)
    lax.fori_loop(0, S - 1, step, (zeros, zeros), unroll=True)

    # --- Deferred output projection + error epilogue -------------------------
    preds = (jnp.dot(hs_ref[...], w_out_ref[...],
                     preferred_element_type=jnp.float32)
             + b_out_ref[...])                                     # (S-1, F)
    d = preds - x_ref[1:, :]
    sq = d * d
    # Lane-dense (1, S-1) result via ones @ sq^T (same A@B^T pattern as q@k^T).
    ones_row = jnp.ones((1, F), jnp.float32)
    err_ref[...] = lax.dot_general(
        ones_row, sq,
        dimension_numbers=(((1,), (1,)), ((), ())),
        preferred_element_type=jnp.float32)                        # (1, S-1)


def lstm_anomaly_error(x, w_ih_t, w_hh_t, bias, w_out_t, b_out, hidden_size):
    """Wrapper: x (S, F) float32 -> per-step squared prediction error (S-1,)."""
    S, F = x.shape
    H = hidden_size
    G = 4 * H

    kernel = functools.partial(_lstm_error_kernel, hidden_size=H)
    vmem = pl.BlockSpec(memory_space=pltpu.MemorySpace.VMEM)

    flops = 2 * (S - 1) * (F * G + H * G + H * F) + 3 * (S - 1) * F
    transcendentals = (2 * G + H) * (S - 1)
    bytes_accessed = 4 * (x.size + w_ih_t.size + w_hh_t.size + bias.size
                          + w_out_t.size + b_out.size + (S - 1))

    # NOTE(v7x): at this S everything is tiny; if S scales, re-budget resident
    # buffers (x, gx, hs ~ S*(F+5H)*4 bytes) against the 64 MiB VMEM / 32 MiB
    # scoped default, and tile the sequence with an 'arbitrary' grid axis.
    # NOTE(v7x): with batch > 1, add a leading 'parallel' batch grid axis to
    # use the second TensorCore; batch=1 here, nothing to shard.
    err = pl.pallas_call(
        kernel,
        out_shape=jax.ShapeDtypeStruct((1, S - 1), jnp.float32),
        in_specs=[vmem] * 6,
        out_specs=vmem,
        scratch_shapes=[
            pltpu.VMEM((S - 1, G), jnp.float32),   # hoisted input projection
            pltpu.VMEM((S - 1, H), jnp.float32),   # hidden-state history
        ],
        cost_estimate=pl.CostEstimate(flops=flops,
                                      transcendentals=transcendentals,
                                      bytes_accessed=bytes_accessed),
    )(x, w_ih_t, w_hh_t, bias, w_out_t, b_out)
    return err[0]


def reference_error(x, w_ih_t, w_hh_t, bias, w_out_t, b_out, H):
    """Pure-JAX reference of the same math (for a correctness check)."""
    def step(carry, x_t):
        h, c = carry
        gates = x_t @ w_ih_t + h @ w_hh_t + bias[0]
        i_g = jax.nn.sigmoid(gates[:H])
        f_g = jax.nn.sigmoid(gates[H:2 * H])
        g_g = jnp.tanh(gates[2 * H:3 * H])
        o_g = jax.nn.sigmoid(gates[3 * H:])
        c = f_g * c + i_g * g_g
        h = o_g * jnp.tanh(c)
        pred = h @ w_out_t + b_out[0]
        return (h, c), pred

    init = (jnp.zeros((H,), jnp.float32), jnp.zeros((H,), jnp.float32))
    _, preds = lax.scan(step, init, x[:-1])
    return jnp.sum((preds - x[1:]) ** 2, axis=-1)


if __name__ == "__main__":
    S, F, H = 8, 16, 32          # seq len, input features, LSTM hidden size

    key = jax.random.PRNGKey(0)
    kx, k1, k2, k3, k4, k5, k6 = jax.random.split(key, 7)
    scale = 1.0 / jnp.sqrt(jnp.float32(H))   # PyTorch-style uniform init range

    x = jax.random.normal(kx, (S, F), dtype=jnp.float32)

    # Pre-transposed parameters (see kernel docstring for layouts).
    w_ih_t = jax.random.uniform(k1, (F, 4 * H), jnp.float32, -scale, scale)
    w_hh_t = jax.random.uniform(k2, (H, 4 * H), jnp.float32, -scale, scale)
    b_ih   = jax.random.uniform(k3, (1, 4 * H), jnp.float32, -scale, scale)
    b_hh   = jax.random.uniform(k4, (1, 4 * H), jnp.float32, -scale, scale)
    bias   = b_ih + b_hh
    w_out_t = jax.random.uniform(k5, (H, F), jnp.float32, -scale, scale)
    b_out   = jax.random.uniform(k6, (1, F), jnp.float32, -scale, scale)

    err = lstm_anomaly_error(x, w_ih_t, w_hh_t, bias, w_out_t, b_out, H)
    err = jax.block_until_ready(err)

    ref = jax.block_until_ready(
        reference_error(x, w_ih_t, w_hh_t, bias, w_out_t, b_out, H))

    assert err.shape == (S - 1,), err.shape
    assert jnp.allclose(err, ref, rtol=1e-4, atol=1e-4), (err, ref)
    print("KERNEL_OK")
</pallas_src>

<mosaic_0001>
module attributes {stable_mosaic.version = 11 : i64} {
  func.func @_lstm_error_kernel(%arg0: memref<8x16xf32, #tpu.memory_space<vmem>>, %arg1: memref<16x128xf32, #tpu.memory_space<vmem>>, %arg2: memref<32x128xf32, #tpu.memory_space<vmem>>, %arg3: memref<1x128xf32, #tpu.memory_space<vmem>>, %arg4: memref<32x16xf32, #tpu.memory_space<vmem>>, %arg5: memref<1x16xf32, #tpu.memory_space<vmem>>, %arg6: memref<1x7xf32, #tpu.memory_space<vmem>>, %arg7: memref<7x128xf32, #tpu.memory_space<vmem>>, %arg8: memref<7x32xf32, #tpu.memory_space<vmem>>) attributes {dimension_semantics = [], scalar_prefetch = 0 : i64, scratch_operands = 2 : i64, tpu.core_type = #tpu.core_type<tc>} {
    %c0 = arith.constant 0 : index
    %c0_0 = arith.constant 0 : index
    %0 = vector.load %arg0[%c0, %c0_0] : memref<8x16xf32, #tpu.memory_space<vmem>>, vector<7x16xf32>
    %c0_1 = arith.constant 0 : index
    %c0_2 = arith.constant 0 : index
    %1 = vector.load %arg1[%c0_1, %c0_2] : memref<16x128xf32, #tpu.memory_space<vmem>>, vector<16x128xf32>
    %cst = arith.constant dense<0.000000e+00> : vector<7x128xf32>
    %2 = tpu.matmul %0, %1, %cst {dimension_numbers = #tpu.dot_dimension_numbers<[1], [0], [0], [1], [0, 0, 1, 1], [], []>} : vector<7x16xf32>, vector<16x128xf32>, vector<7x128xf32> -> vector<7x128xf32>
    %c0_3 = arith.constant 0 : index
    %c0_4 = arith.constant 0 : index
    %3 = vector.load %arg3[%c0_3, %c0_4] : memref<1x128xf32, #tpu.memory_space<vmem>>, vector<1x128xf32>
    %4 = vector.broadcast %3 : vector<1x128xf32> to vector<7x128xf32>
    %5 = arith.addf %2, %4 : vector<7x128xf32>
    %c0_5 = arith.constant 0 : index
    %c0_6 = arith.constant 0 : index
    %6 = vector.load %arg7[%c0_5, %c0_6] : memref<7x128xf32, #tpu.memory_space<vmem>>, vector<7x128xf32>
    tpu.vector_store %arg7[%c0_5, %c0_6], %5 {strides = array<i32>} : memref<7x128xf32, #tpu.memory_space<vmem>>, vector<7x128xf32>,
    %c0_7 = arith.constant 0 : index
    %c0_8 = arith.constant 0 : index
    %7 = vector.load %arg2[%c0_7, %c0_8] : memref<32x128xf32, #tpu.memory_space<vmem>>, vector<32x128xf32>
    %8 = tpu.iota {dimensions = array<i32: 1>} : vector<1x128xi32>
    %c64_i32 = arith.constant 64 : i32
    %9 = vector.broadcast %c64_i32 : i32 to vector<1x128xi32>
    %10 = arith.cmpi sge, %8, %9 : vector<1x128xi32>
    %c96_i32 = arith.constant 96 : i32
    %11 = vector.broadcast %c96_i32 : i32 to vector<1x128xi32>
    %12 = arith.cmpi slt, %8, %11 : vector<1x128xi32>
    %13 = arith.andi %10, %12 : vector<1x128xi1>
    %cst_9 = arith.constant 0.000000e+00 : f32
    %14 = vector.broadcast %cst_9 : f32 to vector<1x32xf32>
    %c0_i32 = arith.constant 0 : i32
    %cst_10 = arith.constant dense<0.000000e+00> : vector<1x128xf32>
    %15 = tpu.matmul %14, %7, %cst_10 {dimension_numbers = #tpu.dot_dimension_numbers<[1], [0], [0], [1], [0, 0, 1, 1], [], []>} : vector<1x32xf32>, vector<32x128xf32>, vector<1x128xf32> -> vector<1x128xf32>
    %16 = arith.index_cast %c0_i32 : i32 to index
    %c0_11 = arith.constant 0 : index
    %17 = vector.load %arg7[%16, %c0_11] : memref<7x128xf32, #tpu.memory_space<vmem>>, vector<1x128xf32>
    %18 = arith.addf %15, %17 : vector<1x128xf32>
    %19 = math.tanh %18 : vector<1x128xf32>
    %20 = arith.negf %18 : vector<1x128xf32>
    %21 = math.exp %20 : vector<1x128xf32>
    %cst_12 = arith.constant 1.000000e+00 : f32
    %22 = vector.broadcast %cst_12 : f32 to vector<1x128xf32>
    %23 = arith.addf %22, %21 : vector<1x128xf32>
    %24 = arith.divf %22, %23 : vector<1x128xf32>
    %25 = arith.select %13, %19, %24 : vector<1x128xi1>, vector<1x128xf32>
    %26 = vector.extract_strided_slice %25 {offsets = [0, 0], sizes = [1, 32], strides = [1, 1]} : vector<1x128xf32> to vector<1x32xf32>
    %27 = vector.extract_strided_slice %25 {offsets = [0, 32], sizes = [1, 32], strides = [1, 1]} : vector<1x128xf32> to vector<1x32xf32>
    %28 = vector.extract_strided_slice %25 {offsets = [0, 64], sizes = [1, 32], strides = [1, 1]} : vector<1x128xf32> to vector<1x32xf32>
    %29 = vector.extract_strided_slice %25 {offsets = [0, 96], sizes = [1, 32], strides = [1, 1]} : vector<1x128xf32> to vector<1x32xf32>
    %30 = arith.mulf %27, %14 : vector<1x32xf32>
    %31 = arith.mulf %26, %28 : vector<1x32xf32>
    %32 = arith.addf %30, %31 : vector<1x32xf32>
    %33 = math.tanh %32 : vector<1x32xf32>
    %34 = arith.mulf %29, %33 : vector<1x32xf32>
    %35 = arith.index_cast %c0_i32 : i32 to index
    %c0_13 = arith.constant 0 : index
    %36 = vector.load %arg8[%35, %c0_13] : memref<7x32xf32, #tpu.memory_space<vmem>>, vector<1x32xf32>
    tpu.vector_store %arg8[%35, %c0_13], %34 {strides = array<i32>} : memref<7x32xf32, #tpu.memory_space<vmem>>, vector<1x32xf32>,
    %c1_i32 = arith.constant 1 : i32
    %cst_14 = arith.constant dense<0.000000e+00> : vector<1x128xf32>
    %37 = tpu.matmul %34, %7, %cst_14 {dimension_numbers = #tpu.dot_dimension_numbers<[1], [0], [0], [1], [0, 0, 1, 1], [], []>} : vector<1x32xf32>, vector<32x128xf32>, vector<1x128xf32> -> vector<1x128xf32>
    %38 = arith.index_cast %c1_i32 : i32 to index
    %c0_15 = arith.constant 0 : index
    %39 = vector.load %arg7[%38, %c0_15] : memref<7x128xf32, #tpu.memory_space<vmem>>, vector<1x128xf32>
    %40 = arith.addf %37, %39 : vector<1x128xf32>
    %41 = math.tanh %40 : vector<1x128xf32>
    %42 = arith.negf %40 : vector<1x128xf32>
    %43 = math.exp %42 : vector<1x128xf32>
    %cst_16 = arith.constant 1.000000e+00 : f32
    %44 = vector.broadcast %cst_16 : f32 to vector<1x128xf32>
    %45 = arith.addf %44, %43 : vector<1x128xf32>
    %46 = arith.divf %44, %45 : vector<1x128xf32>
    %47 = arith.select %13, %41, %46 : vector<1x128xi1>, vector<1x128xf32>
    %48 = vector.extract_strided_slice %47 {offsets = [0, 0], sizes = [1, 32], strides = [1, 1]} : vector<1x128xf32> to vector<1x32xf32>
    %49 = vector.extract_strided_slice %47 {offsets = [0, 32], sizes = [1, 32], strides = [1, 1]} : vector<1x128xf32> to vector<1x32xf32>
    %50 = vector.extract_strided_slice %47 {offsets = [0, 64], sizes = [1, 32], strides = [1, 1]} : vector<1x128xf32> to vector<1x32xf32>
    %51 = vector.extract_strided_slice %47 {offsets = [0, 96], sizes = [1, 32], strides = [1, 1]} : vector<1x128xf32> to vector<1x32xf32>
    %52 = arith.mulf %49, %32 : vector<1x32xf32>
    %53 = arith.mulf %48, %50 : vector<1x32xf32>
    %54 = arith.addf %52, %53 : vector<1x32xf32>
    %55 = math.tanh %54 : vector<1x32xf32>
    %56 = arith.mulf %51, %55 : vector<1x32xf32>
    %57 = arith.index_cast %c1_i32 : i32 to index
    %c0_17 = arith.constant 0 : index
    %58 = vector.load %arg8[%57, %c0_17] : memref<7x32xf32, #tpu.memory_space<vmem>>, vector<1x32xf32>
    tpu.vector_store %arg8[%57, %c0_17], %56 {strides = array<i32>} : memref<7x32xf32, #tpu.memory_space<vmem>>, vector<1x32xf32>,
    %c2_i32 = arith.constant 2 : i32
    %cst_18 = arith.constant dense<0.000000e+00> : vector<1x128xf32>
    %59 = tpu.matmul %56, %7, %cst_18 {dimension_numbers = #tpu.dot_dimension_numbers<[1], [0], [0], [1], [0, 0, 1, 1], [], []>} : vector<1x32xf32>, vector<32x128xf32>, vector<1x128xf32> -> vector<1x128xf32>
    %60 = arith.index_cast %c2_i32 : i32 to index
    %c0_19 = arith.constant 0 : index
    %61 = vector.load %arg7[%60, %c0_19] : memref<7x128xf32, #tpu.memory_space<vmem>>, vector<1x128xf32>
    %62 = arith.addf %59, %61 : vector<1x128xf32>
    %63 = math.tanh %62 : vector<1x128xf32>
    %64 = arith.negf %62 : vector<1x128xf32>
    %65 = math.exp %64 : vector<1x128xf32>
    %cst_20 = arith.constant 1.000000e+00 : f32
    %66 = vector.broadcast %cst_20 : f32 to vector<1x128xf32>
    %67 = arith.addf %66, %65 : vector<1x128xf32>
    %68 = arith.divf %66, %67 : vector<1x128xf32>
    %69 = arith.select %13, %63, %68 : vector<1x128xi1>, vector<1x128xf32>
    %70 = vector.extract_strided_slice %69 {offsets = [0, 0], sizes = [1, 32], strides = [1, 1]} : vector<1x128xf32> to vector<1x32xf32>
    %71 = vector.extract_strided_slice %69 {offsets = [0, 32], sizes = [1, 32], strides = [1, 1]} : vector<1x128xf32> to vector<1x32xf32>
    %72 = vector.extract_strided_slice %69 {offsets = [0, 64], sizes = [1, 32], strides = [1, 1]} : vector<1x128xf32> to vector<1x32xf32>
    %73 = vector.extract_strided_slice %69 {offsets = [0, 96], sizes = [1, 32], strides = [1, 1]} : vector<1x128xf32> to vector<1x32xf32>
    %74 = arith.mulf %71, %54 : vector<1x32xf32>
    %75 = arith.mulf %70, %72 : vector<1x32xf32>
    %76 = arith.addf %74, %75 : vector<1x32xf32>
    %77 = math.tanh %76 : vector<1x32xf32>
    %78 = arith.mulf %73, %77 : vector<1x32xf32>
    %79 = arith.index_cast %c2_i32 : i32 to index
    %c0_21 = arith.constant 0 : index
    %80 = vector.load %arg8[%79, %c0_21] : memref<7x32xf32, #tpu.memory_space<vmem>>, vector<1x32xf32>
    tpu.vector_store %arg8[%79, %c0_21], %78 {strides = array<i32>} : memref<7x32xf32, #tpu.memory_space<vmem>>, vector<1x32xf32>,
    %c3_i32 = arith.constant 3 : i32
    %cst_22 = arith.constant dense<0.000000e+00> : vector<1x128xf32>
    %81 = tpu.matmul %78, %7, %cst_22 {dimension_numbers = #tpu.dot_dimension_numbers<[1], [0], [0], [1], [0, 0, 1, 1], [], []>} : vector<1x32xf32>, vector<32x128xf32>, vector<1x128xf32> -> vector<1x128xf32>
    %82 = arith.index_cast %c3_i32 : i32 to index
    %c0_23 = arith.constant 0 : index
    %83 = vector.load %arg7[%82, %c0_23] : memref<7x128xf32, #tpu.memory_space<vmem>>, vector<1x128xf32>
    %84 = arith.addf %81, %83 : vector<1x128xf32>
    %85 = math.tanh %84 : vector<1x128xf32>
    %86 = arith.negf %84 : vector<1x128xf32>
    %87 = math.exp %86 : vector<1x128xf32>
    %cst_24 = arith.constant 1.000000e+00 : f32
    %88 = vector.broadcast %cst_24 : f32 to vector<1x128xf32>
    %89 = arith.addf %88, %87 : vector<1x128xf32>
    %90 = arith.divf %88, %89 : vector<1x128xf32>
    %91 = arith.select %13, %85, %90 : vector<1x128xi1>, vector<1x128xf32>
    %92 = vector.extract_strided_slice %91 {offsets = [0, 0], sizes = [1, 32], strides = [1, 1]} : vector<1x128xf32> to vector<1x32xf32>
    %93 = vector.extract_strided_slice %91 {offsets = [0, 32], sizes = [1, 32], strides = [1, 1]} : vector<1x128xf32> to vector<1x32xf32>
    %94 = vector.extract_strided_slice %91 {offsets = [0, 64], sizes = [1, 32], strides = [1, 1]} : vector<1x128xf32> to vector<1x32xf32>
    %95 = vector.extract_strided_slice %91 {offsets = [0, 96], sizes = [1, 32], strides = [1, 1]} : vector<1x128xf32> to vector<1x32xf32>
    %96 = arith.mulf %93, %76 : vector<1x32xf32>
    %97 = arith.mulf %92, %94 : vector<1x32xf32>
    %98 = arith.addf %96, %97 : vector<1x32xf32>
    %99 = math.tanh %98 : vector<1x32xf32>
    %100 = arith.mulf %95, %99 : vector<1x32xf32>
    %101 = arith.index_cast %c3_i32 : i32 to index
    %c0_25 = arith.constant 0 : index
    %102 = vector.load %arg8[%101, %c0_25] : memref<7x32xf32, #tpu.memory_space<vmem>>, vector<1x32xf32>
    tpu.vector_store %arg8[%101, %c0_25], %100 {strides = array<i32>} : memref<7x32xf32, #tpu.memory_space<vmem>>, vector<1x32xf32>,
    %c4_i32 = arith.constant 4 : i32
    %cst_26 = arith.constant dense<0.000000e+00> : vector<1x128xf32>
    %103 = tpu.matmul %100, %7, %cst_26 {dimension_numbers = #tpu.dot_dimension_numbers<[1], [0], [0], [1], [0, 0, 1, 1], [], []>} : vector<1x32xf32>, vector<32x128xf32>, vector<1x128xf32> -> vector<1x128xf32>
    %104 = arith.index_cast %c4_i32 : i32 to index
    %c0_27 = arith.constant 0 : index
    %105 = vector.load %arg7[%104, %c0_27] : memref<7x128xf32, #tpu.memory_space<vmem>>, vector<1x128xf32>
    %106 = arith.addf %103, %105 : vector<1x128xf32>
    %107 = math.tanh %106 : vector<1x128xf32>
    %108 = arith.negf %106 : vector<1x128xf32>
    %109 = math.exp %108 : vector<1x128xf32>
    %cst_28 = arith.constant 1.000000e+00 : f32
    %110 = vector.broadcast %cst_28 : f32 to vector<1x128xf32>
    %111 = arith.addf %110, %109 : vector<1x128xf32>
    %112 = arith.divf %110, %111 : vector<1x128xf32>
    %113 = arith.select %13, %107, %112 : vector<1x128xi1>, vector<1x128xf32>
    %114 = vector.extract_strided_slice %113 {offsets = [0, 0], sizes = [1, 32], strides = [1, 1]} : vector<1x128xf32> to vector<1x32xf32>
    %115 = vector.extract_strided_slice %113 {offsets = [0, 32], sizes = [1, 32], strides = [1, 1]} : vector<1x128xf32> to vector<1x32xf32>
    %116 = vector.extract_strided_slice %113 {offsets = [0, 64], sizes = [1, 32], strides = [1, 1]} : vector<1x128xf32> to vector<1x32xf32>
    %117 = vector.extract_strided_slice %113 {offsets = [0, 96], sizes = [1, 32], strides = [1, 1]} : vector<1x128xf32> to vector<1x32xf32>
    %118 = arith.mulf %115, %98 : vector<1x32xf32>
    %119 = arith.mulf %114, %116 : vector<1x32xf32>
    %120 = arith.addf %118, %119 : vector<1x32xf32>
    %121 = math.tanh %120 : vector<1x32xf32>
    %122 = arith.mulf %117, %121 : vector<1x32xf32>
    %123 = arith.index_cast %c4_i32 : i32 to index
    %c0_29 = arith.constant 0 : index
    %124 = vector.load %arg8[%123, %c0_29] : memref<7x32xf32, #tpu.memory_space<vmem>>, vector<1x32xf32>
    tpu.vector_store %arg8[%123, %c0_29], %122 {strides = array<i32>} : memref<7x32xf32, #tpu.memory_space<vmem>>, vector<1x32xf32>,
    %c5_i32 = arith.constant 5 : i32
    %cst_30 = arith.constant dense<0.000000e+00> : vector<1x128xf32>
    %125 = tpu.matmul %122, %7, %cst_30 {dimension_numbers = #tpu.dot_dimension_numbers<[1], [0], [0], [1], [0, 0, 1, 1], [], []>} : vector<1x32xf32>, vector<32x128xf32>, vector<1x128xf32> -> vector<1x128xf32>
    %126 = arith.index_cast %c5_i32 : i32 to index
    %c0_31 = arith.constant 0 : index
    %127 = vector.load %arg7[%126, %c0_31] : memref<7x128xf32, #tpu.memory_space<vmem>>, vector<1x128xf32>
    %128 = arith.addf %125, %127 : vector<1x128xf32>
    %129 = math.tanh %128 : vector<1x128xf32>
    %130 = arith.negf %128 : vector<1x128xf32>
    %131 = math.exp %130 : vector<1x128xf32>
    %cst_32 = arith.constant 1.000000e+00 : f32
    %132 = vector.broadcast %cst_32 : f32 to vector<1x128xf32>
    %133 = arith.addf %132, %131 : vector<1x128xf32>
    %134 = arith.divf %132, %133 : vector<1x128xf32>
    %135 = arith.select %13, %129, %134 : vector<1x128xi1>, vector<1x128xf32>
    %136 = vector.extract_strided_slice %135 {offsets = [0, 0], sizes = [1, 32], strides = [1, 1]} : vector<1x128xf32> to vector<1x32xf32>
    %137 = vector.extract_strided_slice %135 {offsets = [0, 32], sizes = [1, 32], strides = [1, 1]} : vector<1x128xf32> to vector<1x32xf32>
    %138 = vector.extract_strided_slice %135 {offsets = [0, 64], sizes = [1, 32], strides = [1, 1]} : vector<1x128xf32> to vector<1x32xf32>
    %139 = vector.extract_strided_slice %135 {offsets = [0, 96], sizes = [1, 32], strides = [1, 1]} : vector<1x128xf32> to vector<1x32xf32>
    %140 = arith.mulf %137, %120 : vector<1x32xf32>
    %141 = arith.mulf %136, %138 : vector<1x32xf32>
    %142 = arith.addf %140, %141 : vector<1x32xf32>
    %143 = math.tanh %142 : vector<1x32xf32>
    %144 = arith.mulf %139, %143 : vector<1x32xf32>
    %145 = arith.index_cast %c5_i32 : i32 to index
    %c0_33 = arith.constant 0 : index
    %146 = vector.load %arg8[%145, %c0_33] : memref<7x32xf32, #tpu.memory_space<vmem>>, vector<1x32xf32>
    tpu.vector_store %arg8[%145, %c0_33], %144 {strides = array<i32>} : memref<7x32xf32, #tpu.memory_space<vmem>>, vector<1x32xf32>,
    %c6_i32 = arith.constant 6 : i32
    %cst_34 = arith.constant dense<0.000000e+00> : vector<1x128xf32>
    %147 = tpu.matmul %144, %7, %cst_34 {dimension_numbers = #tpu.dot_dimension_numbers<[1], [0], [0], [1], [0, 0, 1, 1], [], []>} : vector<1x32xf32>, vector<32x128xf32>, vector<1x128xf32> -> vector<1x128xf32>
    %148 = arith.index_cast %c6_i32 : i32 to index
    %c0_35 = arith.constant 0 : index
    %149 = vector.load %arg7[%148, %c0_35] : memref<7x128xf32, #tpu.memory_space<vmem>>, vector<1x128xf32>
    %150 = arith.addf %147, %149 : vector<1x128xf32>
    %151 = math.tanh %150 : vector<1x128xf32>
    %152 = arith.negf %150 : vector<1x128xf32>
    %153 = math.exp %152 : vector<1x128xf32>
    %cst_36 = arith.constant 1.000000e+00 : f32
    %154 = vector.broadcast %cst_36 : f32 to vector<1x128xf32>
    %155 = arith.addf %154, %153 : vector<1x128xf32>
    %156 = arith.divf %154, %155 : vector<1x128xf32>
    %157 = arith.select %13, %151, %156 : vector<1x128xi1>, vector<1x128xf32>
    %158 = vector.extract_strided_slice %157 {offsets = [0, 0], sizes = [1, 32], strides = [1, 1]} : vector<1x128xf32> to vector<1x32xf32>
    %159 = vector.extract_strided_slice %157 {offsets = [0, 32], sizes = [1, 32], strides = [1, 1]} : vector<1x128xf32> to vector<1x32xf32>
    %160 = vector.extract_strided_slice %157 {offsets = [0, 64], sizes = [1, 32], strides = [1, 1]} : vector<1x128xf32> to vector<1x32xf32>
    %161 = vector.extract_strided_slice %157 {offsets = [0, 96], sizes = [1, 32], strides = [1, 1]} : vector<1x128xf32> to vector<1x32xf32>
    %162 = arith.mulf %159, %142 : vector<1x32xf32>
    %163 = arith.mulf %158, %160 : vector<1x32xf32>
    %164 = arith.addf %162, %163 : vector<1x32xf32>
    %165 = math.tanh %164 : vector<1x32xf32>
    %166 = arith.mulf %161, %165 : vector<1x32xf32>
    %167 = arith.index_cast %c6_i32 : i32 to index
    %c0_37 = arith.constant 0 : index
    %168 = vector.load %arg8[%167, %c0_37] : memref<7x32xf32, #tpu.memory_space<vmem>>, vector<1x32xf32>
    tpu.vector_store %arg8[%167, %c0_37], %166 {strides = array<i32>} : memref<7x32xf32, #tpu.memory_space<vmem>>, vector<1x32xf32>,
    %c7_i32 = arith.constant 7 : i32
    %c0_38 = arith.constant 0 : index
    %c0_39 = arith.constant 0 : index
    %169 = vector.load %arg8[%c0_38, %c0_39] : memref<7x32xf32, #tpu.memory_space<vmem>>, vector<7x32xf32>
    %c0_40 = arith.constant 0 : index
    %c0_41 = arith.constant 0 : index
    %170 = vector.load %arg4[%c0_40, %c0_41] : memref<32x16xf32, #tpu.memory_space<vmem>>, vector<32x16xf32>
    %cst_42 = arith.constant dense<0.000000e+00> : vector<7x16xf32>
    %171 = tpu.matmul %169, %170, %cst_42 {dimension_numbers = #tpu.dot_dimension_numbers<[1], [0], [0], [1], [0, 0, 1, 1], [], []>} : vector<7x32xf32>, vector<32x16xf32>, vector<7x16xf32> -> vector<7x16xf32>
    %c0_43 = arith.constant 0 : index
    %c0_44 = arith.constant 0 : index
    %172 = vector.load %arg5[%c0_43, %c0_44] : memref<1x16xf32, #tpu.memory_space<vmem>>, vector<1x16xf32>
    %173 = vector.broadcast %172 : vector<1x16xf32> to vector<7x16xf32>
    %174 = arith.addf %171, %173 : vector<7x16xf32>
    %c1 = arith.constant 1 : index
    %c0_45 = arith.constant 0 : index
    %175 = vector.load %arg0[%c1, %c0_45] : memref<8x16xf32, #tpu.memory_space<vmem>>, vector<7x16xf32>
    %176 = arith.subf %174, %175 : vector<7x16xf32>
    %177 = arith.mulf %176, %176 : vector<7x16xf32>
    %cst_46 = arith.constant 1.000000e+00 : f32
    %178 = vector.broadcast %cst_46 : f32 to vector<1x16xf32>
    %cst_47 = arith.constant dense<0.000000e+00> : vector<1x7xf32>
    %179 = tpu.matmul %178, %177, %cst_47 {dimension_numbers = #tpu.dot_dimension_numbers<[1], [1], [0], [0], [0, 0, 1, 0], [], []>} : vector<1x16xf32>, vector<7x16xf32>, vector<1x7xf32> -> vector<1x7xf32>
    %c0_48 = arith.constant 0 : index
    %c0_49 = arith.constant 0 : index
    %180 = vector.load %arg6[%c0_48, %c0_49] : memref<1x7xf32, #tpu.memory_space<vmem>>, vector<1x7xf32>
    tpu.vector_store %arg6[%c0_48, %c0_49], %179 {strides = array<i32>} : memref<1x7xf32, #tpu.memory_space<vmem>>, vector<1x7xf32>,
    return
  }
}

</mosaic_0001>

<bundles_post_ra>
// kernel: tpu_custom_call.1
= control target key start
LH: loop header
LB: loop body
LE: loop exit
PB: predicated region body
PF: predicated region fallthrough
CT: control target
= control target key end

     0   :  { %11 = vsyncpa [#allocation5], 0  ;;  %s1545_s0 = inlined_call_operand.hbm [shape: f32[8,16], index: 0, kind: input, shape index: {}]   ;;  %s1546_s1 = inlined_call_operand.vmem [shape: f32[16,128], index: 1, kind: input, shape index: {}]   ;;  %s1547_s2 = inlined_call_operand.vmem [shape: f32[32,128], index: 2, kind: input, shape index: {}]   ;;  %s1548_s3 = inlined_call_operand.vmem [shape: f32[1,128], index: 3, kind: input, shape index: {}]   ;;  %s1549_s4 = inlined_call_operand.vmem [shape: f32[32,16], index: 4, kind: input, shape index: {}]   ;;  %s1550_s5 = inlined_call_operand.vmem [shape: f32[1,16], index: 5, kind: input, shape index: {}]   ;;  %s1551_s6 = inlined_call_operand.hbm [shape: f32[1,7], index: 6, kind: output, shape index: {}]  }
   0x1   :  { %12 = vsyncpa [#allocation6], 0  ;;  %s1306_s21 = smov [#allocation4]  }
   0x2   :  { %s19_s22 = sshll.u32 %s1306_s21, 4  ;;  %s20_s22 = int_to_ptr.vmem [resolvable:$true] %s19_s22 }
   0x3   :  { %s1270_s23 = scalar_lea.vmem %s20_s22, 128  ;;  %p1275_p1 = scmp.lt.s32.totalorder %s20_s22, %s20_s22 }
   0x4   :  { %p1271_p0 = scmp.ne.s32.totalorder %s20_s22, %s1270_s23  ;;  %p1276_p2 = scmp.lt.s32.totalorder %s1270_s23, %s1270_s23 }
   0x6   :  { %p1277_p3 = por %p1276_p2, %p1275_p1 }
   0x8   :  { %p1278_p4 = pnand %p1277_p3, %p1271_p0 }
   0xa   :  { %1281 = shalt.err (!%p1278_p4)
}
   0xb   :  { %22 = dma.hbm_to_vmem [thread:$0]  %s1545_s0, 128, %s20_s22, [#allocation5]  }
   0xc   :  { %1302 = dma.done.wait [#allocation5], 128  }
   0xd   :  { %1303 = vsyncadd [#allocation5], 4294967168  ;;  %v1307_v0 = vmov 0.0   ;;  %vm1308_vm0 = vmmov 0   ;;  %v38_v1 = vld [vmem:[%s1546_s1 + $0x8] sm:$0xff]  ;;  %v37_v2 = vld [vmem:[%s1546_s1] sm:$0xff]  ;;  %v125_v19 = vlaneseq }
   0xe   :  { %1099 = vmatprep.subr.mxu0 %v1307_v0  ;;  %1103 = vmatprep.mubr.msk.f32.mxu0 %vm1308_vm0, %v1307_v0  ;;  %v36_v3 = vld [vmem:[#allocation4] sm:$0x7f]  ;;  %vm46_vm1 = vcmask 130048   ;;  %v1366_v4 = vld [vmem:[%s1547_s2 + $0x18] sm:$0xff]  ;;  %v1379_v6 = vld [vmem:[%s1547_s2 + $0x8] sm:$0xff]  ;;  %s1310_s13 = smov 32  }
   0xf   :  { %1106 = vmatprep.subr.mxu1 %v1307_v0  ;;  %1114 = vmatprep.mubr.msk.f32.mxu1 %vm1308_vm0, %v1307_v0  ;;  %v1371_v5 = vld [vmem:[%s1547_s2 + $0x10] sm:$0xff]  ;;  %v1387_v7 = vld [vmem:[%s1547_s2] sm:$0xff]  ;;  %v126_v20 = vand.u32 127, %v125_v19  ;;  %vm234_vm5 = vcmask 253952   ;;  %vm131_vm6 = vcmask 261120   ;;  %vm1018_vm7 = vcmask 49152  }
  0x10   :  { %1100 = vmatpush3.msra.mxu0 %v38_v1  ;;  %1107 = vmatpush3.msra.mxu1 %v1366_v4  ;;  %v1035_v8 = vld [vmem:[%s1548_s3] ss:$0 sm:$0xff]  ;;  %s1309_s3 = smov 64   ;;  %v857_v21 = vld [vmem:[%s1549_s4 + $0x10] sm:$0xff] }
  0x11   :  { %1101 = vmatprep.subr.mxu0 %v1307_v0  ;;  %1108 = vmatprep.subr.mxu1 %v1307_v0  ;;  %vm127_vm2 = vcmp.ge.s32.totalorder %v126_v20, 64  ;;  %vm128_vm3 = vcmp.lt.s32.totalorder %v126_v20, 96 }
  0x12   :  { %1102 = vmatpush3.msra.mxu0 %v37_v2  ;;  %1109 = vmatpush3.msra.mxu1 %v1371_v5  ;;  %vm1418_vm4 = vmand %vm127_vm2, %vm128_vm3 }
  0x13   :  { %1104 = vmatmul.mubr.msk.f32.vlgmr.msra.gmra.mxu0 %vm46_vm1, %v36_v3  ;;  %1110 = vmatprep.subr.mxu1 %v1307_v0 }
  0x14   :  { %1117 = vmatprep.subr.mxu0 %v1307_v0  ;;  %1111 = vmatpush3.msra.mxu1 %v1379_v6 }
  0x15   :  { %1118 = vmatpush3.msra.mxu0 %v1366_v4  ;;  %1112 = vmatprep.subr.mxu1 %v1307_v0 }
  0x16   :  { %1119 = vmatprep.subr.mxu0 %v1307_v0  ;;  %1113 = vmatpush3.msra.mxu1 %v1387_v7 }
  0x17   :  { %1120 = vmatpush3.msra.mxu0 %v1371_v5  ;;  %1115 = vmatmul.mubr.f32.vlgmr.msra.gmra.mxu1 %v1307_v0 }
  0x18   :  { %1121 = vmatprep.subr.mxu0 %v1307_v0  ;;  %1125 = vmatprep.mubr.msk.f32.mxu0 %vm1308_vm0, %v1307_v0 }
  0x19   :  { %1122 = vmatpush3.msra.mxu0 %v1379_v6  ;;  %1128 = vmatprep.subr.mxu1 %v1307_v0 }
  0x1a   :  { %1123 = vmatprep.subr.mxu0 %v1307_v0  ;;  %1129 = vmatpush3.msra.mxu1 %v1366_v4 }
  0x1b   :  { %1124 = vmatpush3.msra.mxu0 %v1387_v7  ;;  %1130 = vmatprep.subr.mxu1 %v1307_v0 }
  0x1c   :  { %1136 = vmatprep.mubr.msk.f32.mxu1 %vm1308_vm0, %v1307_v0  ;;  %1131 = vmatpush3.msra.mxu1 %v1371_v5 }
  0x1d   :  { %1139 = vmatprep.subr.mxu0 %v1307_v0  ;;  %1132 = vmatprep.subr.mxu1 %v1307_v0 }
  0x1e   :  { %1133 = vmatpush3.msra.mxu1 %v1379_v6 }
  0x1f   :  { %1134 = vmatprep.subr.mxu1 %v1307_v0 }
  0x20   :  { %1135 = vmatpush3.msra.mxu1 %v1387_v7 }
  0x21   :  { %1150 = vmatprep.subr.mxu1 %v1307_v0 }
  0xd3   :  { %v116_v9 = vpop.f32.mrf.mxu0 }
  0xd4   :  { %v117_v10 = vadd.f32 %v1035_v8, %v116_v9 }
  0xd5   :  { %v1105_v11 = vpop.f32.mrf.mxu0 }
  0xd6   :  { %120 = vst [vmem:[#allocation2] sm:$0x7f] %v117_v10 }
  0xd7   :  { %v201_v12 = vpop.f32.mrf.mxu1 }
  0xd9   :  { %v1116_v13 = vpop.f32.mrf.mxu1 }
  0xdd   :  { %v130_v14 = vld [vmem:[#allocation2] sm:$0x1]  ;;  %v236_v34 = vld [vmem:[#allocation2 + $0x1] sm:$0x1]  ;;  %v339_v53 = vld [vmem:[#allocation2 + $0x2] sm:$0x1] }
  0xde   :  { %v202_v15 = vadd.f32 %v201_v12, %v130_v14  ;;  %v442_v13 = vld [vmem:[#allocation2 + $0x3] sm:$0x1] }
  0xe0   :  { %v1037_v16 = vmul.f32 -1.442695, %v202_v15 }
  0xe2   :  { %1206 = vpow2.f32 %v1037_v16 }
  0xe3   :  { %1208 = vtanh.f32 %v202_v15 }
  0xef   :  { %v1207_v17 = vpop.eup %1206 }
  0xf0   :  { %v209_v18 = vadd.f32 1.0, %v1207_v17  ;;  %v1209_v22 = vpop.eup %1208 }
  0xf2   :  { %1210 = vrcp.f32 %v209_v18 }
  0xff   :  { %v1211_v23 = vpop.eup %1210 }
 0x100   :  { %v212_v24 = vsel %vm1418_vm4, %v1209_v22, %v1211_v23 }
 0x101   :  { %215 = vrot.lane.b32.xlu0 %v212_v24, %s1309_s3  ;;  %v213_v27 = vmul.f32 0.0, %v212_v24 }
 0x173   :  { %v216_v25 = vpop.permute.xlu0 %215 }
 0x174   :  { %v218_v26 = vmul.f32 %v216_v25, %v212_v24 }
 0x176   :  { %220 = vrot.lane.b32.xlu0 %v218_v26, %s1310_s13 }
 0x1e8   :  { %v221_v28 = vpop.permute.xlu0 %220 }
 0x1e9   :  { %v223_v29 = vadd.f32 %v221_v28, %v213_v27 }
 0x1eb   :  { %1212 = vtanh.f32 %v223_v29 }
 0x1f8   :  { %v1213_v30 = vpop.eup %1212 }
 0x1f9   :  { %226 = vrot.lane.b32.xlu1 %v1213_v30, %s1309_s3 }
 0x26b   :  { %v227_v31 = vpop.permute.xlu1 %226 }
 0x26c   :  { %v229_v32 = vmul.f32 %v227_v31, %v212_v24 }
 0x26e   :  { %231 = vrot.lane.b32.xlu1 %v229_v32, %s1310_s13 }
 0x2e0   :  { %v232_v33 = vpop.permute.xlu1 %231 }
 0x2e1   :  { %235 = vst.msk [vmem:[#allocation3] sm:$0x1] %vm234_vm5, %v232_v33  ;;  %1126 = vmatmul.mubr.msk.f32.vlgmr.msra.gmra.mxu0 %vm131_vm6, %v232_v33  ;;  %v545_v33 = vld [vmem:[#allocation2 + $0x4] sm:$0x1] }
 0x2e2   :  { %1140 = vmatpush3.msra.mxu0 %v1366_v4  ;;  %1147 = vmatprep.mubr.msk.f32.mxu0 %vm1308_vm0, %v1307_v0 }
 0x2e3   :  { %1141 = vmatprep.subr.mxu0 %v1307_v0 }
 0x2e4   :  { %1142 = vmatpush3.msra.mxu0 %v1371_v5 }
 0x2e5   :  { %1143 = vmatprep.subr.mxu0 %v1307_v0 }
 0x2e6   :  { %1144 = vmatpush3.msra.mxu0 %v1379_v6 }
 0x2e7   :  { %1145 = vmatprep.subr.mxu0 %v1307_v0 }
 0x2e8   :  { %1146 = vmatpush3.msra.mxu0 %v1387_v7 }
 0x2e9   :  { %1161 = vmatprep.subr.mxu0 %v1307_v0 }
 0x3a1   :  { %v305_v35 = vpop.f32.mrf.mxu0 }
 0x3a2   :  { %v306_v36 = vadd.f32 %v305_v35, %v236_v34 }
 0x3a3   :  { %v1127_v37 = vpop.f32.mrf.mxu0 }
 0x3a4   :  { %v1039_v38 = vmul.f32 -1.442695, %v306_v36 }
 0x3a6   :  { %1214 = vpow2.f32 %v1039_v38 }
 0x3a7   :  { %1216 = vtanh.f32 %v306_v36 }
 0x3b3   :  { %v1215_v39 = vpop.eup %1214 }
 0x3b4   :  { %v313_v40 = vadd.f32 1.0, %v1215_v39  ;;  %v1217_v41 = vpop.eup %1216 }
 0x3b6   :  { %1218 = vrcp.f32 %v313_v40 }
 0x3c3   :  { %v1219_v42 = vpop.eup %1218 }
 0x3c4   :  { %v316_v43 = vsel %vm1418_vm4, %v1217_v41, %v1219_v42 }
 0x3c5   :  { %319 = vrot.lane.b32.xlu0 %v316_v43, %s1309_s3  ;;  %v317_v46 = vmul.f32 %v316_v43, %v223_v29 }
 0x437   :  { %v320_v44 = vpop.permute.xlu0 %319 }
 0x438   :  { %v322_v45 = vmul.f32 %v320_v44, %v316_v43 }
 0x43a   :  { %324 = vrot.lane.b32.xlu1 %v322_v45, %s1310_s13 }
 0x4ac   :  { %v325_v47 = vpop.permute.xlu1 %324 }
 0x4ad   :  { %v327_v48 = vadd.f32 %v325_v47, %v317_v46 }
 0x4af   :  { %1220 = vtanh.f32 %v327_v48 }
 0x4bc   :  { %v1221_v49 = vpop.eup %1220 }
 0x4bd   :  { %330 = vrot.lane.b32.xlu0 %v1221_v49, %s1309_s3 }
 0x52f   :  { %v331_v50 = vpop.permute.xlu0 %330 }
 0x530   :  { %v333_v51 = vmul.f32 %v331_v50, %v316_v43 }
 0x532   :  { %335 = vrot.lane.b32.xlu1 %v333_v51, %s1310_s13 }
 0x5a4   :  { %v336_v52 = vpop.permute.xlu1 %335 }
 0x5a5   :  { %338 = vst.msk [vmem:[#allocation3 + $0x1] sm:$0x1] %vm234_vm5, %v336_v52  ;;  %1137 = vmatmul.mubr.msk.f32.vlgmr.msra.gmra.mxu1 %vm131_vm6, %v336_v52 }
 0x5a6   :  { %1151 = vmatpush3.msra.mxu1 %v1366_v4  ;;  %1158 = vmatprep.mubr.msk.f32.mxu1 %vm1308_vm0, %v1307_v0 }
 0x5a7   :  { %1152 = vmatprep.subr.mxu1 %v1307_v0 }
 0x5a8   :  { %1153 = vmatpush3.msra.mxu1 %v1371_v5 }
 0x5a9   :  { %1154 = vmatprep.subr.mxu1 %v1307_v0 }
 0x5aa   :  { %1155 = vmatpush3.msra.mxu1 %v1379_v6 }
 0x5ab   :  { %1156 = vmatprep.subr.mxu1 %v1307_v0 }
 0x5ac   :  { %1157 = vmatpush3.msra.mxu1 %v1387_v7 }
 0x5ad   :  { %1172 = vmatprep.subr.mxu1 %v1307_v0 }
 0x665   :  { %v408_v54 = vpop.f32.mrf.mxu1 }
 0x666   :  { %v409_v55 = vadd.f32 %v408_v54, %v339_v53 }
 0x667   :  { %v1138_v56 = vpop.f32.mrf.mxu1 }
 0x668   :  { %v1041_v57 = vmul.f32 -1.442695, %v409_v55 }
 0x66a   :  { %1222 = vpow2.f32 %v1041_v57 }
 0x66b   :  { %1224 = vtanh.f32 %v409_v55 }
 0x677   :  { %v1223_v58 = vpop.eup %1222 }
 0x678   :  { %v416_v59 = vadd.f32 1.0, %v1223_v58  ;;  %v1225_v60 = vpop.eup %1224 }
 0x67a   :  { %1226 = vrcp.f32 %v416_v59 }
 0x687   :  { %v1227_v61 = vpop.eup %1226 }
 0x688   :  { %v419_v62 = vsel %vm1418_vm4, %v1225_v60, %v1227_v61 }
 0x689   :  { %422 = vrot.lane.b32.xlu0 %v419_v62, %s1309_s3  ;;  %v420_v2 = vmul.f32 %v419_v62, %v327_v48  ;;  %v648_v48 = vld [vmem:[#allocation2 + $0x5] sm:$0x1] }
 0x6fb   :  { %v423_v63 = vpop.permute.xlu0 %422 }
 0x6fc   :  { %v425_v1 = vmul.f32 %v423_v63, %v419_v62 }
 0x6fe   :  { %427 = vrot.lane.b32.xlu1 %v425_v1, %s1310_s13 }
 0x770   :  { %v428_v3 = vpop.permute.xlu1 %427 }
 0x771   :  { %v430_v8 = vadd.f32 %v428_v3, %v420_v2 }
 0x773   :  { %1228 = vtanh.f32 %v430_v8 }
 0x780   :  { %v1229_v9 = vpop.eup %1228 }
 0x781   :  { %433 = vrot.lane.b32.xlu0 %v1229_v9, %s1309_s3 }
 0x7f3   :  { %v434_v10 = vpop.permute.xlu0 %433 }
 0x7f4   :  { %v436_v11 = vmul.f32 %v434_v10, %v419_v62 }
 0x7f6   :  { %438 = vrot.lane.b32.xlu1 %v436_v11, %s1310_s13 }
 0x868   :  { %v439_v12 = vpop.permute.xlu1 %438 }
 0x869   :  { %441 = vst.msk [vmem:[#allocation3 + $0x2] sm:$0x1] %vm234_vm5, %v439_v12  ;;  %1148 = vmatmul.mubr.msk.f32.vlgmr.msra.gmra.mxu0 %vm131_vm6, %v439_v12 }
 0x86a   :  { %1162 = vmatpush3.msra.mxu0 %v1366_v4  ;;  %1169 = vmatprep.mubr.msk.f32.mxu0 %vm1308_vm0, %v1307_v0 }
 0x86b   :  { %1163 = vmatprep.subr.mxu0 %v1307_v0 }
 0x86c   :  { %1164 = vmatpush3.msra.mxu0 %v1371_v5 }
 0x86d   :  { %1165 = vmatprep.subr.mxu0 %v1307_v0 }
 0x86e   :  { %1166 = vmatpush3.msra.mxu0 %v1379_v6 }
 0x86f   :  { %1167 = vmatprep.subr.mxu0 %v1307_v0 }
 0x870   :  { %1168 = vmatpush3.msra.mxu0 %v1387_v7 }
 0x871   :  { %1183 = vmatprep.subr.mxu0 %v1307_v0 }
 0x929   :  { %v511_v14 = vpop.f32.mrf.mxu0 }
 0x92a   :  { %v512_v15 = vadd.f32 %v511_v14, %v442_v13 }
 0x92b   :  { %v1149_v16 = vpop.f32.mrf.mxu0 }
 0x92c   :  { %v1043_v17 = vmul.f32 -1.442695, %v512_v15 }
 0x92e   :  { %1230 = vpow2.f32 %v1043_v17 }
 0x92f   :  { %1232 = vtanh.f32 %v512_v15 }
 0x93b   :  { %v1231_v18 = vpop.eup %1230 }
 0x93c   :  { %v519_v19 = vadd.f32 1.0, %v1231_v18  ;;  %v1233_v20 = vpop.eup %1232 }
 0x93e   :  { %1234 = vrcp.f32 %v519_v19 }
 0x94b   :  { %v1235_v22 = vpop.eup %1234 }
 0x94c   :  { %v522_v23 = vsel %vm1418_vm4, %v1233_v20, %v1235_v22 }
 0x94d   :  { %525 = vrot.lane.b32.xlu0 %v522_v23, %s1309_s3  ;;  %v523_v26 = vmul.f32 %v522_v23, %v430_v8  ;;  %v751_v8 = vld [vmem:[#allocation2 + $0x6] sm:$0x1] }
 0x9bf   :  { %v526_v24 = vpop.permute.xlu0 %525 }
 0x9c0   :  { %v528_v25 = vmul.f32 %v526_v24, %v522_v23 }
 0x9c2   :  { %530 = vrot.lane.b32.xlu1 %v528_v25, %s1310_s13  ;;  %v858_v25 = vld [vmem:[%s1549_s4 + $0x18] sm:$0xff] }
 0xa34   :  { %v531_v27 = vpop.permute.xlu1 %530 }
 0xa35   :  { %v533_v28 = vadd.f32 %v531_v27, %v523_v26  ;;  %v856_v26 = vld [vmem:[%s1549_s4 + $0x8] sm:$0xff]  ;;  %v855_v27 = vld [vmem:[%s1549_s4] sm:$0xff]  ;;  %s1312_s4 = smov [#allocation7]  }
 0xa36   :  { %s1026_s24 = sshll.u32 %s1312_s4, 4  ;;  %s1027_s24 = int_to_ptr.vmem [resolvable:$true] %s1026_s24 }
 0xa37   :  { %1236 = vtanh.f32 %v533_v28  ;;  %s1282_s25 = scalar_lea.vmem %s1027_s24, 16  ;;  %p1287_p6 = scmp.lt.s32.totalorder %s1027_s24, %s1027_s24 }
 0xa38   :  { %p1283_p5 = scmp.ne.s32.totalorder %s1027_s24, %s1282_s25 }
 0xa44   :  { %v1237_v29 = vpop.eup %1236 }
 0xa45   :  { %536 = vrot.lane.b32.xlu0 %v1237_v29, %s1309_s3 }
 0xab7   :  { %v537_v30 = vpop.permute.xlu0 %536 }
 0xab8   :  { %v539_v31 = vmul.f32 %v537_v30, %v522_v23 }
 0xaba   :  { %541 = vrot.lane.b32.xlu1 %v539_v31, %s1310_s13 }
 0xb2c   :  { %v542_v32 = vpop.permute.xlu1 %541 }
 0xb2d   :  { %544 = vst.msk [vmem:[#allocation3 + $0x3] sm:$0x1] %vm234_vm5, %v542_v32  ;;  %1159 = vmatmul.mubr.msk.f32.vlgmr.msra.gmra.mxu1 %vm131_vm6, %v542_v32  ;;  %v1050_v32 = vld [vmem:[%s1550_s5] ss:$0 sm:$0xff]  ;;  %s1286_s5 = scalar_lea.vmem %s1027_s24, 32 }
 0xb2e   :  { %1173 = vmatpush3.msra.mxu1 %v1366_v4  ;;  %1180 = vmatprep.mubr.msk.f32.mxu1 %vm1308_vm0, %v1307_v0  ;;  %p1288_p7 = scmp.lt.s32.totalorder %s1286_s5, %s1282_s25 }
 0xb2f   :  { %1174 = vmatprep.subr.mxu1 %v1307_v0 }
 0xb30   :  { %1175 = vmatpush3.msra.mxu1 %v1371_v5  ;;  %p1289_p8 = por %p1288_p7, %p1287_p6 }
 0xb31   :  { %1176 = vmatprep.subr.mxu1 %v1307_v0 }
 0xb32   :  { %1177 = vmatpush3.msra.mxu1 %v1379_v6  ;;  %p1290_p9 = pnand %p1289_p8, %p1283_p5 }
 0xb33   :  { %1178 = vmatprep.subr.mxu1 %v1307_v0 }
 0xb34   :  { %1179 = vmatpush3.msra.mxu1 %v1387_v7 }
 0xb35   :  { %1194 = vmatprep.subr.mxu1 %v1307_v0 }
 0xbed   :  { %v614_v34 = vpop.f32.mrf.mxu1 }
 0xbee   :  { %v615_v4 = vadd.f32 %v614_v34, %v545_v33  ;;  %v939_v34 = vld [vmem:[#allocation4 + $0x1] sm:$0x7f] }
 0xbef   :  { %v1160_v35 = vpop.f32.mrf.mxu1 }
 0xbf0   :  { %v1045_v36 = vmul.f32 -1.442695, %v615_v4 }
 0xbf2   :  { %1238 = vpow2.f32 %v1045_v36 }
 0xbf3   :  { %1240 = vtanh.f32 %v615_v4 }
 0xbff   :  { %v1239_v37 = vpop.eup %1238 }
 0xc00   :  { %v622_v38 = vadd.f32 1.0, %v1239_v37  ;;  %v1241_v5 = vpop.eup %1240  ;;  %v1311_v37 = vmov 1.0  }
 0xc02   :  { %1242 = vrcp.f32 %v622_v38 }
 0xc0f   :  { %v1243_v39 = vpop.eup %1242 }
 0xc10   :  { %v625_v6 = vsel %vm1418_vm4, %v1241_v5, %v1243_v39 }
 0xc11   :  { %628 = vrot.lane.b32.xlu0 %v625_v6, %s1309_s3  ;;  %v626_v41 = vmul.f32 %v625_v6, %v533_v28 }
 0xc83   :  { %v629_v7 = vpop.permute.xlu0 %628 }
 0xc84   :  { %v631_v40 = vmul.f32 %v629_v7, %v625_v6 }
 0xc86   :  { %633 = vrot.lane.b32.xlu1 %v631_v40, %s1310_s13 }
 0xcf8   :  { %v634_v42 = vpop.permute.xlu1 %633 }
 0xcf9   :  { %v636_v43 = vadd.f32 %v634_v42, %v626_v41 }
 0xcfb   :  { %1244 = vtanh.f32 %v636_v43 }
 0xd08   :  { %v1245_v44 = vpop.eup %1244 }
 0xd09   :  { %639 = vrot.lane.b32.xlu0 %v1245_v44, %s1309_s3 }
 0xd7b   :  { %v640_v45 = vpop.permute.xlu0 %639 }
 0xd7c   :  { %v642_v46 = vmul.f32 %v640_v45, %v625_v6 }
 0xd7e   :  { %644 = vrot.lane.b32.xlu1 %v642_v46, %s1310_s13 }
 0xdf0   :  { %v645_v47 = vpop.permute.xlu1 %644 }
 0xdf1   :  { %647 = vst.msk [vmem:[#allocation3 + $0x4] sm:$0x1] %vm234_vm5, %v645_v47  ;;  %1170 = vmatmul.mubr.msk.f32.vlgmr.msra.gmra.mxu0 %vm131_vm6, %v645_v47 }
 0xdf2   :  { %1191 = vmatprep.mubr.msk.f32.mxu0 %vm1308_vm0, %v1307_v0  ;;  %1184 = vmatpush3.msra.mxu0 %v858_v25 }
 0xdf3   :  { %1185 = vmatprep.subr.mxu0 %v1307_v0 }
 0xdf4   :  { %1186 = vmatpush3.msra.mxu0 %v857_v21 }
 0xdf5   :  { %1187 = vmatprep.subr.mxu0 %v1307_v0 }
 0xdf6   :  { %1188 = vmatpush3.msra.mxu0 %v856_v26 }
 0xdf7   :  { %1189 = vmatprep.subr.mxu0 %v1307_v0 }
 0xdf8   :  { %1190 = vmatpush3.msra.mxu0 %v855_v27 }
 0xeb1   :  { %v717_v49 = vpop.f32.mrf.mxu0 }
 0xeb2   :  { %v718_v50 = vadd.f32 %v717_v49, %v648_v48 }
 0xeb3   :  { %v1171_v51 = vpop.f32.mrf.mxu0 }
 0xeb4   :  { %v1047_v52 = vmul.f32 -1.442695, %v718_v50 }
 0xeb6   :  { %1246 = vpow2.f32 %v1047_v52 }
 0xeb7   :  { %1248 = vtanh.f32 %v718_v50 }
 0xec3   :  { %v1247_v53 = vpop.eup %1246 }
 0xec4   :  { %v725_v54 = vadd.f32 1.0, %v1247_v53  ;;  %v1249_v55 = vpop.eup %1248 }
 0xec6   :  { %1250 = vrcp.f32 %v725_v54 }
 0xed3   :  { %v1251_v56 = vpop.eup %1250 }
 0xed4   :  { %v728_v57 = vsel %vm1418_vm4, %v1249_v55, %v1251_v56 }
 0xed5   :  { %731 = vrot.lane.b32.xlu0 %v728_v57, %s1309_s3  ;;  %v729_v60 = vmul.f32 %v728_v57, %v636_v43 }
 0xf47   :  { %v732_v58 = vpop.permute.xlu0 %731 }
 0xf48   :  { %v734_v59 = vmul.f32 %v732_v58, %v728_v57 }
 0xf4a   :  { %736 = vrot.lane.b32.xlu1 %v734_v59, %s1310_s13 }
 0xfbc   :  { %v737_v61 = vpop.permute.xlu1 %736 }
 0xfbd   :  { %v739_v62 = vadd.f32 %v737_v61, %v729_v60 }
 0xfbf   :  { %1252 = vtanh.f32 %v739_v62 }
 0xfcc   :  { %v1253_v63 = vpop.eup %1252 }
 0xfcd   :  { %742 = vrot.lane.b32.xlu0 %v1253_v63, %s1309_s3 }
0x103f   :  { %v743_v1 = vpop.permute.xlu0 %742 }
0x1040   :  { %v745_v2 = vmul.f32 %v743_v1, %v728_v57 }
0x1042   :  { %747 = vrot.lane.b32.xlu1 %v745_v2, %s1310_s13 }
0x10b4   :  { %v748_v3 = vpop.permute.xlu1 %747 }
0x10b5   :  { %750 = vst.msk [vmem:[#allocation3 + $0x5] sm:$0x1] %vm234_vm5, %v748_v3  ;;  %1181 = vmatmul.mubr.msk.f32.vlgmr.msra.gmra.mxu1 %vm131_vm6, %v748_v3 }
0x10b6   :  { %1196 = vmatprep.mubr.msk.f32.mxu1 %vm1308_vm0, %v1307_v0 }
0x1175   :  { %v820_v9 = vpop.f32.mrf.mxu1 }
0x1176   :  { %v821_v10 = vadd.f32 %v820_v9, %v751_v8 }
0x1177   :  { %v1182_v11 = vpop.f32.mrf.mxu1 }
0x1178   :  { %v1049_v12 = vmul.f32 -1.442695, %v821_v10 }
0x117a   :  { %1254 = vpow2.f32 %v1049_v12 }
0x117b   :  { %1256 = vtanh.f32 %v821_v10 }
0x1187   :  { %v1255_v13 = vpop.eup %1254 }
0x1188   :  { %v828_v14 = vadd.f32 1.0, %v1255_v13  ;;  %v1257_v15 = vpop.eup %1256 }
0x118a   :  { %1258 = vrcp.f32 %v828_v14 }
0x1197   :  { %v1259_v16 = vpop.eup %1258 }
0x1198   :  { %v831_v17 = vsel %vm1418_vm4, %v1257_v15, %v1259_v16 }
0x1199   :  { %834 = vrot.lane.b32.xlu0 %v831_v17, %s1309_s3  ;;  %v832_v20 = vmul.f32 %v831_v17, %v739_v62 }
0x120b   :  { %v835_v18 = vpop.permute.xlu0 %834 }
0x120c   :  { %v837_v19 = vmul.f32 %v835_v18, %v831_v17 }
0x120e   :  { %839 = vrot.lane.b32.xlu1 %v837_v19, %s1310_s13 }
0x1280   :  { %v840_v22 = vpop.permute.xlu1 %839 }
0x1281   :  { %v842_v23 = vadd.f32 %v840_v22, %v832_v20 }
0x1283   :  { %1260 = vtanh.f32 %v842_v23 }
0x1290   :  { %v1261_v24 = vpop.eup %1260 }
0x1291   :  { %845 = vrot.lane.b32.xlu0 %v1261_v24, %s1309_s3 }
0x1303   :  { %v846_v28 = vpop.permute.xlu0 %845 }
0x1304   :  { %v848_v29 = vmul.f32 %v846_v28, %v831_v17 }
0x1306   :  { %850 = vrot.lane.b32.xlu1 %v848_v29, %s1310_s13 }
0x1378   :  { %v851_v30 = vpop.permute.xlu1 %850 }
0x1379   :  { %853 = vst.msk [vmem:[#allocation3 + $0x6] sm:$0x1] %vm234_vm5, %v851_v30 }
0x1380   :  { %v854_v31 = vld [vmem:[#allocation3] sm:$0x7f] }
0x1381   :  { %1192 = vmatmul.mubr.msk.f32.vlgmr.msra.gmra.mxu0 %vm131_vm6, %v854_v31 }
0x1441   :  { %v935_v33 = vpop.f32.mrf.mxu0 }
0x1442   :  { %v936_v4 = vadd.f32 %v1050_v32, %v935_v33 }
0x1443   :  { %v1193_v35 = vpop.f32.mrf.mxu0 }
0x1444   :  { %v940_v0 = vsub.f32 %v936_v4, %v939_v34 }
0x1446   :  { %v941_v36 = vmul.f32 %v940_v0, %v940_v0 }
0x1448   :  { %1195 = vmatpush3.xpose.msk.msra.mxu1 %vm46_vm1, %v941_v36 }
0x144b   :  { %1197 = vmatmul.mubr.msk.f32.vlgmr.msra.gmra.mxu1 %vm46_vm1, %v1311_v37 }
0x150b   :  { %v1014_v38 = vpop.f32.mrf.mxu1 }
0x150c   :  { %1019 = vst.msk [vmem:[#allocation7] sm:$0x1] %vm1018_vm7, %v1014_v38 }
0x150d   :  { %v1198_v5 = vpop.f32.mrf.mxu1 }
0x150e   :  { %1293 = shalt.err (!%p1290_p9)
}
0x150f   :  { %1029 = dma.vmem_to_hbm [thread:$0]  %s1027_s24, 16, %s1551_s6, [#allocation6]  }
0x1510   :  { %1304 = dma.done.wait [#allocation6], 16  }
0x1511   :  { %1305 = vsyncadd [#allocation6], 4294967280 }
0x1512   :  { %1033 = vsyncpa [#allocation5], 1 }
0x1513   :  { %1034 = vsyncpa [#allocation6], 1 }

</bundles_post_ra>
